<compile_context>
chip_gen: v5e
topology: v5e:2x2
jax: 0.10.0
libtpu: 0.0.40
codegen_flags: <defaults>
</compile_context>

<pallas_src>
import math
import jax
import jax.numpy as jnp
from jax.experimental import pallas as pl
from jax.experimental.pallas import tpu as pltpu

# ----- model dims (small, consistent with the module's forward) -----
B = 2            # batch
S = 8            # sequence length
H = 32           # hidden_size
NH = 4           # attention heads
HD = H // NH     # head dim
FF = 4 * H       # FFN intermediate
C = 11           # num_classes
CPAD = 128       # lane-dense padded class dim (unmasked output store)
VOCAB = 100
DROPOUT_P = 0.5


def _layernorm(x, g, b):
    mu = jnp.mean(x, axis=-1, keepdims=True)
    var = jnp.mean((x - mu) ** 2, axis=-1, keepdims=True)
    return (x - mu) * jax.lax.rsqrt(var + 1e-12) * g + b


def bert_classifier_kernel(
    x_ref,      # (B, S, H)   f32 embeddings
    mask_ref,   # (B, 1, S)   f32 additive attention mask (0 / -1e9)
    dmask_ref,  # (B, H)      f32 pre-scaled dropout keep mask
    wqkv_ref,   # (H, 3H)     bf16 fused QKV weights (1/sqrt(HD) folded into Wq)
    wo_ref,     # (H, H)      bf16 attention output projection
    wf1_ref,    # (H, FF)     bf16
    wf2_ref,    # (FF, H)     bf16
    wp_ref,     # (H, H)      bf16 pooler
    wc_ref,     # (H, CPAD)   bf16 classifier, zero-padded to 128 lanes
    vec_ref,    # (10, CPAD)  f32 packed biases / LayerNorm params
    out_ref,    # (B, CPAD)   f32 logits (lane-dense; sliced to C outside)
):
    f32 = jnp.float32
    bf16 = jnp.bfloat16

    # ---- packed small vectors: one operand instead of ~16 separate DMAs ----
    bqkv = vec_ref[0:1, 0:3 * H]
    bo   = vec_ref[1:2, 0:H]
    ln1g = vec_ref[2:3, 0:H]
    ln1b = vec_ref[3:4, 0:H]
    bf1  = vec_ref[4:5, 0:FF]
    bf2  = vec_ref[5:6, 0:H]
    ln2g = vec_ref[6:7, 0:H]
    ln2b = vec_ref[7:8, 0:H]
    bp   = vec_ref[8:9, 0:H]
    bc   = vec_ref[9:10, :]

    x = x_ref[...]                        # (B, S, H) f32
    xf = x.reshape(B * S, H)              # whole batch in one step
    xb = xf.astype(bf16)

    # ---- fused QKV: single (B*S, H) x (H, 3H) MXU matmul (scale pre-folded) ----
    qkv = jnp.dot(xb, wqkv_ref[...], preferred_element_type=f32) + bqkv   # (B*S, 3H) f32

    # ---- head-batched attention: (B*NH, S, HD), two batched matmuls total ----
    def heads(base):
        parts = [
            qkv[:, base + h * HD: base + (h + 1) * HD].reshape(B, S, HD)
            for h in range(NH)
        ]
        # stack heads on a leading (non-lane) axis:  n = h * B + b
        return jnp.stack(parts, axis=0).reshape(NH * B, S, HD)

    q = heads(0 * H).astype(bf16)
    k = heads(1 * H).astype(bf16)
    v = heads(2 * H).astype(bf16)

    madd = mask_ref[...]                                                  # (B, 1, S) f32
    madd = jnp.broadcast_to(madd[None], (NH, B, 1, S)).reshape(NH * B, 1, S)

    s = jnp.einsum("nqd,nkd->nqk", q, k, preferred_element_type=f32)      # (B*NH, S, S)
    s = s + madd                                                          # mask applied once
    s = s - jnp.max(s, axis=-1, keepdims=True)
    p = jnp.exp(s)                                                        # f32 softmax
    p = p * pl.reciprocal(jnp.sum(p, axis=-1, keepdims=True), approx=True)
    ctx = jnp.einsum("nqk,nkd->nqd", p.astype(bf16), v,
                     preferred_element_type=f32)                          # (B*NH, S, HD)

    # merge heads back to (B*S, H): one lane-axis concat
    ctx = jnp.concatenate(
        [ctx[h * B:(h + 1) * B].reshape(B * S, HD) for h in range(NH)], axis=-1
    )

    attn = jnp.dot(ctx.astype(bf16), wo_ref[...], preferred_element_type=f32) + bo
    y1 = _layernorm(xf + attn, ln1g, ln1b)                                # f32

    # ---- feed-forward ----
    ff = jnp.dot(y1.astype(bf16), wf1_ref[...], preferred_element_type=f32) + bf1
    # TODO(synk): PyTorch nn.GELU defaults to exact erf; tanh approximation used here.
    ff = jax.nn.gelu(ff)
    ff = jnp.dot(ff.astype(bf16), wf2_ref[...], preferred_element_type=f32) + bf2
    y2 = _layernorm(y1 + ff, ln2g, ln2b)

    # ---- BERT pooler: tanh(W * h_[CLS] + b) ----
    cls = jnp.concatenate([y2[b * S:b * S + 1, :] for b in range(B)], axis=0)   # (B, H)
    pooled = jnp.tanh(
        jnp.dot(cls.astype(bf16), wp_ref[...], preferred_element_type=f32) + bp
    )

    # ---- dropout (training-mode inverted dropout; pre-scaled keep mask) ----
    pooled = pooled * dmask_ref[...]

    # ---- classifier Linear(hidden_size, num_classes), lane-dense padded ----
    logits = jnp.dot(pooled.astype(bf16), wc_ref[...], preferred_element_type=f32) + bc
    out_ref[...] = logits.astype(out_ref.dtype)


def bert_classifier_forward(embeddings, attn_mask_additive, dropout_mask, dense, vecs):
    """embeddings: (B,S,H) f32; attn_mask_additive: (B,1,S) f32;
    dropout_mask: (B,H) f32 (keep/(1-p)); returns logits (B,C) f32."""
    wqkv, wo, wf1, wf2, wp, wc = dense
    out = pl.pallas_call(
        bert_classifier_kernel,
        out_shape=jax.ShapeDtypeStruct((B, CPAD), jnp.float32),
        # no grid: one kernel step for the whole batch (grid/step overhead dominates
        # at these dims); all operands are whole-array VMEM blocks (<1 MiB total,
        # fits easily even in v7x's 64 MiB VMEM).
    )(embeddings, attn_mask_additive, dropout_mask, wqkv, wo, wf1, wf2, wp, wc, vecs)
    return out[:, :C]


def init_params(key):
    ks = jax.random.split(key, 8)
    std = 0.02
    n = lambda k, shape: jax.random.normal(k, shape, jnp.float32) * std
    wq, wk, wv = n(ks[0], (H, H)), n(ks[1], (H, H)), n(ks[2], (H, H))
    scale = 1.0 / math.sqrt(HD)
    wqkv = jnp.concatenate([wq * scale, wk, wv], axis=1)          # (H, 3H); softmax scale folded into Wq
    wo = n(ks[3], (H, H))
    wf1 = n(ks[4], (H, FF))
    wf2 = n(ks[5], (FF, H))
    wp = n(ks[6], (H, H))
    wc = n(ks[7], (H, C))
    wc_pad = jnp.zeros((H, CPAD), jnp.float32).at[:, :C].set(wc)  # lane-dense classifier

    pad = lambda v: jnp.pad(v, (0, CPAD - v.shape[0]))
    zeros = lambda m: jnp.zeros((m,), jnp.float32)
    ones = lambda m: jnp.ones((m,), jnp.float32)
    # rows: bqkv, bo, ln1g, ln1b, bf1, bf2, ln2g, ln2b, bp, bc  -> one (10, 128) f32 operand
    vecs = jnp.stack([
        pad(zeros(3 * H)), pad(zeros(H)),
        pad(ones(H)), pad(zeros(H)),
        pad(zeros(FF)), pad(zeros(H)),
        pad(ones(H)), pad(zeros(H)),
        pad(zeros(H)), pad(zeros(C)),
    ])

    # big dense weights stored bf16 (MXU operands); accumulation stays f32 in-kernel
    dense = tuple(w.astype(jnp.bfloat16) for w in (wqkv, wo, wf1, wf2, wp, wc_pad))
    return dense, vecs


if __name__ == "__main__":
    key = jax.random.PRNGKey(0)
    k_emb, k_pos, k_ids, k_par, k_drop = jax.random.split(key, 5)

    # ---- synthetic deterministic inputs ----
    input_ids = jax.random.randint(k_ids, (B, S), 0, VOCAB)
    attention_mask = jnp.ones((B, S), jnp.int32).at[1, S - 2:].set(0)   # pad last 2 of row 1

    # ---- glue: embedding lookup (word + position) in plain JAX ----
    word_emb = jax.random.normal(k_emb, (VOCAB, H), jnp.float32) * 0.02
    pos_emb = jax.random.normal(k_pos, (S, H), jnp.float32) * 0.02
    embeddings = word_emb[input_ids] + pos_emb[None, :, :]             # (B, S, H)

    # additive attention mask: 0 where attended, -1e9 where padded
    attn_add = (1.0 - attention_mask.astype(jnp.float32))[:, None, :] * -1e9   # (B, 1, S)

    # dropout (p=0.5) keep-mask, inverted scaling, deterministic key
    keep = jax.random.bernoulli(k_drop, 1.0 - DROPOUT_P, (B, H)).astype(jnp.float32)
    dropout_mask = keep / (1.0 - DROPOUT_P)                            # (B, H)

    dense, vecs = init_params(k_par)

    logits = bert_classifier_forward(embeddings, attn_add, dropout_mask, dense, vecs)
    jax.block_until_ready(logits)
    assert logits.shape == (B, C) and logits.dtype == jnp.float32
    print("KERNEL_OK")
</pallas_src>

<mosaic_0001>
module attributes {stable_mosaic.version = 11 : i64} {
  func.func @bert_classifier_kernel(%arg0: memref<2x8x32xf32, #tpu.memory_space<vmem>>, %arg1: memref<2x1x8xf32, #tpu.memory_space<vmem>>, %arg2: memref<2x32xf32, #tpu.memory_space<vmem>>, %arg3: memref<32x96xbf16, #tpu.memory_space<vmem>>, %arg4: memref<32x32xbf16, #tpu.memory_space<vmem>>, %arg5: memref<32x128xbf16, #tpu.memory_space<vmem>>, %arg6: memref<128x32xbf16, #tpu.memory_space<vmem>>, %arg7: memref<32x32xbf16, #tpu.memory_space<vmem>>, %arg8: memref<32x128xbf16, #tpu.memory_space<vmem>>, %arg9: memref<10x128xf32, #tpu.memory_space<vmem>>, %arg10: memref<2x128xf32, #tpu.memory_space<vmem>>) attributes {dimension_semantics = [], scalar_prefetch = 0 : i64, scratch_operands = 0 : i64, tpu.core_type = #tpu.core_type<tc>} {
    %c0 = arith.constant 0 : index
    %c0_0 = arith.constant 0 : index
    %0 = vector.load %arg9[%c0, %c0_0] : memref<10x128xf32, #tpu.memory_space<vmem>>, vector<1x96xf32>
    %c1 = arith.constant 1 : index
    %c0_1 = arith.constant 0 : index
    %1 = vector.load %arg9[%c1, %c0_1] : memref<10x128xf32, #tpu.memory_space<vmem>>, vector<1x32xf32>
    %c2 = arith.constant 2 : index
    %c0_2 = arith.constant 0 : index
    %2 = vector.load %arg9[%c2, %c0_2] : memref<10x128xf32, #tpu.memory_space<vmem>>, vector<1x32xf32>
    %c3 = arith.constant 3 : index
    %c0_3 = arith.constant 0 : index
    %3 = vector.load %arg9[%c3, %c0_3] : memref<10x128xf32, #tpu.memory_space<vmem>>, vector<1x32xf32>
    %c4 = arith.constant 4 : index
    %c0_4 = arith.constant 0 : index
    %4 = vector.load %arg9[%c4, %c0_4] : memref<10x128xf32, #tpu.memory_space<vmem>>, vector<1x128xf32>
    %c5 = arith.constant 5 : index
    %c0_5 = arith.constant 0 : index
    %5 = vector.load %arg9[%c5, %c0_5] : memref<10x128xf32, #tpu.memory_space<vmem>>, vector<1x32xf32>
    %c6 = arith.constant 6 : index
    %c0_6 = arith.constant 0 : index
    %6 = vector.load %arg9[%c6, %c0_6] : memref<10x128xf32, #tpu.memory_space<vmem>>, vector<1x32xf32>
    %c7 = arith.constant 7 : index
    %c0_7 = arith.constant 0 : index
    %7 = vector.load %arg9[%c7, %c0_7] : memref<10x128xf32, #tpu.memory_space<vmem>>, vector<1x32xf32>
    %c8 = arith.constant 8 : index
    %c0_8 = arith.constant 0 : index
    %8 = vector.load %arg9[%c8, %c0_8] : memref<10x128xf32, #tpu.memory_space<vmem>>, vector<1x32xf32>
    %c9 = arith.constant 9 : index
    %c0_9 = arith.constant 0 : index
    %9 = vector.load %arg9[%c9, %c0_9] : memref<10x128xf32, #tpu.memory_space<vmem>>, vector<1x128xf32>
    %c0_10 = arith.constant 0 : index
    %c0_11 = arith.constant 0 : index
    %c0_12 = arith.constant 0 : index
    %10 = vector.load %arg0[%c0_10, %c0_11, %c0_12] : memref<2x8x32xf32, #tpu.memory_space<vmem>>, vector<2x8x32xf32>
    %11 = vector.shape_cast %10 : vector<2x8x32xf32> to vector<16x32xf32>
    %12 = arith.truncf %11 : vector<16x32xf32> to vector<16x32xbf16>
    %c0_13 = arith.constant 0 : index
    %c0_14 = arith.constant 0 : index
    %13 = vector.load %arg3[%c0_13, %c0_14] : memref<32x96xbf16, #tpu.memory_space<vmem>>, vector<32x96xbf16>
    %cst = arith.constant dense<0.000000e+00> : vector<16x96xf32>
    %14 = tpu.matmul %12, %13, %cst {dimension_numbers = #tpu.dot_dimension_numbers<[1], [0], [0], [1], [0, 0, 1, 1], [], []>} : vector<16x32xbf16>, vector<32x96xbf16>, vector<16x96xf32> -> vector<16x96xf32>
    %15 = vector.broadcast %0 : vector<1x96xf32> to vector<16x96xf32>
    %16 = arith.addf %14, %15 : vector<16x96xf32>
    %17 = vector.extract_strided_slice %16 {offsets = [0, 0], sizes = [16, 8], strides = [1, 1]} : vector<16x96xf32> to vector<16x8xf32>
    %18 = vector.shape_cast %17 : vector<16x8xf32> to vector<2x8x8xf32>
    %19 = vector.extract_strided_slice %16 {offsets = [0, 8], sizes = [16, 8], strides = [1, 1]} : vector<16x96xf32> to vector<16x8xf32>
    %20 = vector.shape_cast %19 : vector<16x8xf32> to vector<2x8x8xf32>
    %21 = vector.extract_strided_slice %16 {offsets = [0, 16], sizes = [16, 8], strides = [1, 1]} : vector<16x96xf32> to vector<16x8xf32>
    %22 = vector.shape_cast %21 : vector<16x8xf32> to vector<2x8x8xf32>
    %23 = vector.extract_strided_slice %16 {offsets = [0, 24], sizes = [16, 8], strides = [1, 1]} : vector<16x96xf32> to vector<16x8xf32>
    %24 = vector.shape_cast %23 : vector<16x8xf32> to vector<2x8x8xf32>
    %25 = vector.shape_cast %18 : vector<2x8x8xf32> to vector<1x2x8x8xf32>
    %26 = vector.shape_cast %20 : vector<2x8x8xf32> to vector<1x2x8x8xf32>
    %27 = vector.shape_cast %22 : vector<2x8x8xf32> to vector<1x2x8x8xf32>
    %28 = vector.shape_cast %24 : vector<2x8x8xf32> to vector<1x2x8x8xf32>
    %29 = tpu.concatenate %25, %26, %27, %28 in 0 : vector<1x2x8x8xf32>, vector<1x2x8x8xf32>, vector<1x2x8x8xf32>, vector<1x2x8x8xf32> -> vector<4x2x8x8xf32>
    %30 = vector.shape_cast %29 : vector<4x2x8x8xf32> to vector<8x8x8xf32>
    %31 = arith.truncf %30 : vector<8x8x8xf32> to vector<8x8x8xbf16>
    %32 = vector.extract_strided_slice %16 {offsets = [0, 32], sizes = [16, 8], strides = [1, 1]} : vector<16x96xf32> to vector<16x8xf32>
    %33 = vector.shape_cast %32 : vector<16x8xf32> to vector<2x8x8xf32>
    %34 = vector.extract_strided_slice %16 {offsets = [0, 40], sizes = [16, 8], strides = [1, 1]} : vector<16x96xf32> to vector<16x8xf32>
    %35 = vector.shape_cast %34 : vector<16x8xf32> to vector<2x8x8xf32>
    %36 = vector.extract_strided_slice %16 {offsets = [0, 48], sizes = [16, 8], strides = [1, 1]} : vector<16x96xf32> to vector<16x8xf32>
    %37 = vector.shape_cast %36 : vector<16x8xf32> to vector<2x8x8xf32>
    %38 = vector.extract_strided_slice %16 {offsets = [0, 56], sizes = [16, 8], strides = [1, 1]} : vector<16x96xf32> to vector<16x8xf32>
    %39 = vector.shape_cast %38 : vector<16x8xf32> to vector<2x8x8xf32>
    %40 = vector.shape_cast %33 : vector<2x8x8xf32> to vector<1x2x8x8xf32>
    %41 = vector.shape_cast %35 : vector<2x8x8xf32> to vector<1x2x8x8xf32>
    %42 = vector.shape_cast %37 : vector<2x8x8xf32> to vector<1x2x8x8xf32>
    %43 = vector.shape_cast %39 : vector<2x8x8xf32> to vector<1x2x8x8xf32>
    %44 = tpu.concatenate %40, %41, %42, %43 in 0 : vector<1x2x8x8xf32>, vector<1x2x8x8xf32>, vector<1x2x8x8xf32>, vector<1x2x8x8xf32> -> vector<4x2x8x8xf32>
    %45 = vector.shape_cast %44 : vector<4x2x8x8xf32> to vector<8x8x8xf32>
    %46 = arith.truncf %45 : vector<8x8x8xf32> to vector<8x8x8xbf16>
    %47 = vector.extract_strided_slice %16 {offsets = [0, 64], sizes = [16, 8], strides = [1, 1]} : vector<16x96xf32> to vector<16x8xf32>
    %48 = vector.shape_cast %47 : vector<16x8xf32> to vector<2x8x8xf32>
    %49 = vector.extract_strided_slice %16 {offsets = [0, 72], sizes = [16, 8], strides = [1, 1]} : vector<16x96xf32> to vector<16x8xf32>
    %50 = vector.shape_cast %49 : vector<16x8xf32> to vector<2x8x8xf32>
    %51 = vector.extract_strided_slice %16 {offsets = [0, 80], sizes = [16, 8], strides = [1, 1]} : vector<16x96xf32> to vector<16x8xf32>
    %52 = vector.shape_cast %51 : vector<16x8xf32> to vector<2x8x8xf32>
    %53 = vector.extract_strided_slice %16 {offsets = [0, 88], sizes = [16, 8], strides = [1, 1]} : vector<16x96xf32> to vector<16x8xf32>
    %54 = vector.shape_cast %53 : vector<16x8xf32> to vector<2x8x8xf32>
    %55 = vector.shape_cast %48 : vector<2x8x8xf32> to vector<1x2x8x8xf32>
    %56 = vector.shape_cast %50 : vector<2x8x8xf32> to vector<1x2x8x8xf32>
    %57 = vector.shape_cast %52 : vector<2x8x8xf32> to vector<1x2x8x8xf32>
    %58 = vector.shape_cast %54 : vector<2x8x8xf32> to vector<1x2x8x8xf32>
    %59 = tpu.concatenate %55, %56, %57, %58 in 0 : vector<1x2x8x8xf32>, vector<1x2x8x8xf32>, vector<1x2x8x8xf32>, vector<1x2x8x8xf32> -> vector<4x2x8x8xf32>
    %60 = vector.shape_cast %59 : vector<4x2x8x8xf32> to vector<8x8x8xf32>
    %61 = arith.truncf %60 : vector<8x8x8xf32> to vector<8x8x8xbf16>
    %c0_15 = arith.constant 0 : index
    %c0_16 = arith.constant 0 : index
    %c0_17 = arith.constant 0 : index
    %62 = vector.load %arg1[%c0_15, %c0_16, %c0_17] : memref<2x1x8xf32, #tpu.memory_space<vmem>>, vector<2x1x8xf32>
    %63 = vector.shape_cast %62 : vector<2x1x8xf32> to vector<1x2x1x8xf32>
    %64 = vector.shape_cast %63 : vector<1x2x1x8xf32> to vector<1x2x1x8xf32>
    %65 = vector.broadcast %64 : vector<1x2x1x8xf32> to vector<4x2x1x8xf32>
    %66 = vector.shape_cast %65 : vector<4x2x1x8xf32> to vector<8x1x8xf32>
    "tpu.trace_start"() <{level = 10 : i32, message = "nqd,nkd->nqk"}> : () -> ()
    %cst_18 = arith.constant dense<0.000000e+00> : vector<8x8x8xf32>
    %67 = tpu.matmul %31, %46, %cst_18 {dimension_numbers = #tpu.dot_dimension_numbers<[2], [2], [1], [1], [0, 0, 0, 1, 1, 1], [0], [0]>} : vector<8x8x8xbf16>, vector<8x8x8xbf16>, vector<8x8x8xf32> -> vector<8x8x8xf32>
    "tpu.trace_stop"() : () -> ()
    %68 = vector.broadcast %66 : vector<8x1x8xf32> to vector<8x8x8xf32>
    %69 = arith.addf %67, %68 : vector<8x8x8xf32>
    %cst_19 = arith.constant dense<0xFF800000> : vector<8x8xf32>
    %70 = vector.multi_reduction <maximumf>, %69, %cst_19 [2] : vector<8x8x8xf32> to vector<8x8xf32>
    %71 = vector.shape_cast %70 : vector<8x8xf32> to vector<8x8x1xf32>
    %72 = vector.broadcast %71 : vector<8x8x1xf32> to vector<8x8x8xf32>
    %73 = arith.subf %69, %72 : vector<8x8x8xf32>
    %74 = math.exp %73 : vector<8x8x8xf32>
    %cst_20 = arith.constant dense<0.000000e+00> : vector<8x8xf32>
    %75 = vector.multi_reduction <add>, %74, %cst_20 [2] : vector<8x8x8xf32> to vector<8x8xf32>
    %76 = vector.shape_cast %75 : vector<8x8xf32> to vector<8x8x1xf32>
    %77 = tpu.reciprocal %76 {approx = true} : vector<8x8x1xf32> -> vector<8x8x1xf32>
    %78 = vector.broadcast %77 : vector<8x8x1xf32> to vector<8x8x8xf32>
    %79 = arith.mulf %74, %78 : vector<8x8x8xf32>
    %80 = arith.truncf %79 : vector<8x8x8xf32> to vector<8x8x8xbf16>
    "tpu.trace_start"() <{level = 10 : i32, message = "nqk,nkd->nqd"}> : () -> ()
    %cst_21 = arith.constant dense<0.000000e+00> : vector<8x8x8xf32>
    %81 = tpu.matmul %80, %61, %cst_21 {dimension_numbers = #tpu.dot_dimension_numbers<[2], [1], [1], [2], [0, 0, 0, 1, 1, 2], [0], [0]>} : vector<8x8x8xbf16>, vector<8x8x8xbf16>, vector<8x8x8xf32> -> vector<8x8x8xf32>
    "tpu.trace_stop"() : () -> ()
    %82 = vector.extract_strided_slice %81 {offsets = [0, 0, 0], sizes = [2, 8, 8], strides = [1, 1, 1]} : vector<8x8x8xf32> to vector<2x8x8xf32>
    %83 = vector.shape_cast %82 : vector<2x8x8xf32> to vector<16x8xf32>
    %84 = vector.extract_strided_slice %81 {offsets = [2, 0, 0], sizes = [2, 8, 8], strides = [1, 1, 1]} : vector<8x8x8xf32> to vector<2x8x8xf32>
    %85 = vector.shape_cast %84 : vector<2x8x8xf32> to vector<16x8xf32>
    %86 = vector.extract_strided_slice %81 {offsets = [4, 0, 0], sizes = [2, 8, 8], strides = [1, 1, 1]} : vector<8x8x8xf32> to vector<2x8x8xf32>
    %87 = vector.shape_cast %86 : vector<2x8x8xf32> to vector<16x8xf32>
    %88 = vector.extract_strided_slice %81 {offsets = [6, 0, 0], sizes = [2, 8, 8], strides = [1, 1, 1]} : vector<8x8x8xf32> to vector<2x8x8xf32>
    %89 = vector.shape_cast %88 : vector<2x8x8xf32> to vector<16x8xf32>
    %90 = tpu.concatenate %83, %85, %87, %89 in 1 : vector<16x8xf32>, vector<16x8xf32>, vector<16x8xf32>, vector<16x8xf32> -> vector<16x32xf32>
    %91 = arith.truncf %90 : vector<16x32xf32> to vector<16x32xbf16>
    %c0_22 = arith.constant 0 : index
    %c0_23 = arith.constant 0 : index
    %92 = vector.load %arg4[%c0_22, %c0_23] : memref<32x32xbf16, #tpu.memory_space<vmem>>, vector<32x32xbf16>
    %cst_24 = arith.constant dense<0.000000e+00> : vector<16x32xf32>
    %93 = tpu.matmul %91, %92, %cst_24 {dimension_numbers = #tpu.dot_dimension_numbers<[1], [0], [0], [1], [0, 0, 1, 1], [], []>} : vector<16x32xbf16>, vector<32x32xbf16>, vector<16x32xf32> -> vector<16x32xf32>
    %94 = vector.broadcast %1 : vector<1x32xf32> to vector<16x32xf32>
    %95 = arith.addf %93, %94 : vector<16x32xf32>
    %96 = arith.addf %11, %95 : vector<16x32xf32>
    %cst_25 = arith.constant dense<0.000000e+00> : vector<16xf32>
    %97 = vector.multi_reduction <add>, %96, %cst_25 [1] : vector<16x32xf32> to vector<16xf32>
    %98 = vector.shape_cast %97 : vector<16xf32> to vector<16x1xf32>
    %cst_26 = arith.constant 3.200000e+01 : f32
    %99 = vector.broadcast %cst_26 : f32 to vector<16x1xf32>
    %100 = arith.divf %98, %99 : vector<16x1xf32>
    %101 = vector.broadcast %100 : vector<16x1xf32> to vector<16x32xf32>
    %102 = arith.subf %96, %101 : vector<16x32xf32>
    %103 = arith.mulf %102, %102 : vector<16x32xf32>
    %cst_27 = arith.constant dense<0.000000e+00> : vector<16xf32>
    %104 = vector.multi_reduction <add>, %103, %cst_27 [1] : vector<16x32xf32> to vector<16xf32>
    %105 = vector.shape_cast %104 : vector<16xf32> to vector<16x1xf32>
    %cst_28 = arith.constant 3.200000e+01 : f32
    %106 = vector.broadcast %cst_28 : f32 to vector<16x1xf32>
    %107 = arith.divf %105, %106 : vector<16x1xf32>
    %108 = vector.broadcast %100 : vector<16x1xf32> to vector<16x32xf32>
    %109 = arith.subf %96, %108 : vector<16x32xf32>
    %cst_29 = arith.constant 9.99999996E-13 : f32
    %110 = vector.broadcast %cst_29 : f32 to vector<16x1xf32>
    %111 = arith.addf %107, %110 : vector<16x1xf32>
    %112 = math.rsqrt %111 : vector<16x1xf32>
    %113 = vector.broadcast %112 : vector<16x1xf32> to vector<16x32xf32>
    %114 = arith.mulf %109, %113 : vector<16x32xf32>
    %115 = vector.broadcast %2 : vector<1x32xf32> to vector<16x32xf32>
    %116 = arith.mulf %114, %115 : vector<16x32xf32>
    %117 = vector.broadcast %3 : vector<1x32xf32> to vector<16x32xf32>
    %118 = arith.addf %116, %117 : vector<16x32xf32>
    %119 = arith.truncf %118 : vector<16x32xf32> to vector<16x32xbf16>
    %c0_30 = arith.constant 0 : index
    %c0_31 = arith.constant 0 : index
    %120 = vector.load %arg5[%c0_30, %c0_31] : memref<32x128xbf16, #tpu.memory_space<vmem>>, vector<32x128xbf16>
    %cst_32 = arith.constant dense<0.000000e+00> : vector<16x128xf32>
    %121 = tpu.matmul %119, %120, %cst_32 {dimension_numbers = #tpu.dot_dimension_numbers<[1], [0], [0], [1], [0, 0, 1, 1], [], []>} : vector<16x32xbf16>, vector<32x128xbf16>, vector<16x128xf32> -> vector<16x128xf32>
    %122 = vector.broadcast %4 : vector<1x128xf32> to vector<16x128xf32>
    %123 = arith.addf %121, %122 : vector<16x128xf32>
    %124 = arith.mulf %123, %123 : vector<16x128xf32>
    %125 = arith.mulf %123, %124 : vector<16x128xf32>
    %cst_33 = arith.constant 4.471500e-02 : f32
    %126 = vector.broadcast %cst_33 : f32 to vector<16x128xf32>
    %127 = arith.mulf %126, %125 : vector<16x128xf32>
    %128 = arith.addf %123, %127 : vector<16x128xf32>
    %cst_34 = arith.constant 0.797884583 : f32
    %129 = vector.broadcast %cst_34 : f32 to vector<16x128xf32>
    %130 = arith.mulf %129, %128 : vector<16x128xf32>
    %131 = math.tanh %130 : vector<16x128xf32>
    %cst_35 = arith.constant 1.000000e+00 : f32
    %132 = vector.broadcast %cst_35 : f32 to vector<16x128xf32>
    %133 = arith.addf %132, %131 : vector<16x128xf32>
    %cst_36 = arith.constant 5.000000e-01 : f32
    %134 = vector.broadcast %cst_36 : f32 to vector<16x128xf32>
    %135 = arith.mulf %134, %133 : vector<16x128xf32>
    %136 = arith.mulf %123, %135 : vector<16x128xf32>
    %137 = arith.truncf %136 : vector<16x128xf32> to vector<16x128xbf16>
    %c0_37 = arith.constant 0 : index
    %c0_38 = arith.constant 0 : index
    %138 = vector.load %arg6[%c0_37, %c0_38] : memref<128x32xbf16, #tpu.memory_space<vmem>>, vector<128x32xbf16>
    %cst_39 = arith.constant dense<0.000000e+00> : vector<16x32xf32>
    %139 = tpu.matmul %137, %138, %cst_39 {dimension_numbers = #tpu.dot_dimension_numbers<[1], [0], [0], [1], [0, 0, 1, 1], [], []>} : vector<16x128xbf16>, vector<128x32xbf16>, vector<16x32xf32> -> vector<16x32xf32>
    %140 = vector.broadcast %5 : vector<1x32xf32> to vector<16x32xf32>
    %141 = arith.addf %139, %140 : vector<16x32xf32>
    %142 = arith.addf %118, %141 : vector<16x32xf32>
    %cst_40 = arith.constant dense<0.000000e+00> : vector<16xf32>
    %143 = vector.multi_reduction <add>, %142, %cst_40 [1] : vector<16x32xf32> to vector<16xf32>
    %144 = vector.shape_cast %143 : vector<16xf32> to vector<16x1xf32>
    %cst_41 = arith.constant 3.200000e+01 : f32
    %145 = vector.broadcast %cst_41 : f32 to vector<16x1xf32>
    %146 = arith.divf %144, %145 : vector<16x1xf32>
    %147 = vector.broadcast %146 : vector<16x1xf32> to vector<16x32xf32>
    %148 = arith.subf %142, %147 : vector<16x32xf32>
    %149 = arith.mulf %148, %148 : vector<16x32xf32>
    %cst_42 = arith.constant dense<0.000000e+00> : vector<16xf32>
    %150 = vector.multi_reduction <add>, %149, %cst_42 [1] : vector<16x32xf32> to vector<16xf32>
    %151 = vector.shape_cast %150 : vector<16xf32> to vector<16x1xf32>
    %cst_43 = arith.constant 3.200000e+01 : f32
    %152 = vector.broadcast %cst_43 : f32 to vector<16x1xf32>
    %153 = arith.divf %151, %152 : vector<16x1xf32>
    %154 = vector.broadcast %146 : vector<16x1xf32> to vector<16x32xf32>
    %155 = arith.subf %142, %154 : vector<16x32xf32>
    %cst_44 = arith.constant 9.99999996E-13 : f32
    %156 = vector.broadcast %cst_44 : f32 to vector<16x1xf32>
    %157 = arith.addf %153, %156 : vector<16x1xf32>
    %158 = math.rsqrt %157 : vector<16x1xf32>
    %159 = vector.broadcast %158 : vector<16x1xf32> to vector<16x32xf32>
    %160 = arith.mulf %155, %159 : vector<16x32xf32>
    %161 = vector.broadcast %6 : vector<1x32xf32> to vector<16x32xf32>
    %162 = arith.mulf %160, %161 : vector<16x32xf32>
    %163 = vector.broadcast %7 : vector<1x32xf32> to vector<16x32xf32>
    %164 = arith.addf %162, %163 : vector<16x32xf32>
    %165 = vector.extract_strided_slice %164 {offsets = [0, 0], sizes = [1, 32], strides = [1, 1]} : vector<16x32xf32> to vector<1x32xf32>
    %166 = vector.extract_strided_slice %164 {offsets = [8, 0], sizes = [1, 32], strides = [1, 1]} : vector<16x32xf32> to vector<1x32xf32>
    %167 = tpu.concatenate %165, %166 in 0 : vector<1x32xf32>, vector<1x32xf32> -> vector<2x32xf32>
    %168 = arith.truncf %167 : vector<2x32xf32> to vector<2x32xbf16>
    %c0_45 = arith.constant 0 : index
    %c0_46 = arith.constant 0 : index
    %169 = vector.load %arg7[%c0_45, %c0_46] : memref<32x32xbf16, #tpu.memory_space<vmem>>, vector<32x32xbf16>
    %cst_47 = arith.constant dense<0.000000e+00> : vector<2x32xf32>
    %170 = tpu.matmul %168, %169, %cst_47 {dimension_numbers = #tpu.dot_dimension_numbers<[1], [0], [0], [1], [0, 0, 1, 1], [], []>} : vector<2x32xbf16>, vector<32x32xbf16>, vector<2x32xf32> -> vector<2x32xf32>
    %171 = vector.broadcast %8 : vector<1x32xf32> to vector<2x32xf32>
    %172 = arith.addf %170, %171 : vector<2x32xf32>
    %173 = math.tanh %172 : vector<2x32xf32>
    %c0_48 = arith.constant 0 : index
    %c0_49 = arith.constant 0 : index
    %174 = vector.load %arg2[%c0_48, %c0_49] : memref<2x32xf32, #tpu.memory_space<vmem>>, vector<2x32xf32>
    %175 = arith.mulf %173, %174 : vector<2x32xf32>
    %176 = arith.truncf %175 : vector<2x32xf32> to vector<2x32xbf16>
    %c0_50 = arith.constant 0 : index
    %c0_51 = arith.constant 0 : index
    %177 = vector.load %arg8[%c0_50, %c0_51] : memref<32x128xbf16, #tpu.memory_space<vmem>>, vector<32x128xbf16>
    %cst_52 = arith.constant dense<0.000000e+00> : vector<2x128xf32>
    %178 = tpu.matmul %176, %177, %cst_52 {dimension_numbers = #tpu.dot_dimension_numbers<[1], [0], [0], [1], [0, 0, 1, 1], [], []>} : vector<2x32xbf16>, vector<32x128xbf16>, vector<2x128xf32> -> vector<2x128xf32>
    %179 = vector.broadcast %9 : vector<1x128xf32> to vector<2x128xf32>
    %180 = arith.addf %178, %179 : vector<2x128xf32>
    %c0_53 = arith.constant 0 : index
    %c0_54 = arith.constant 0 : index
    %181 = vector.load %arg10[%c0_53, %c0_54] : memref<2x128xf32, #tpu.memory_space<vmem>>, vector<2x128xf32>
    tpu.vector_store %arg10[%c0_53, %c0_54], %180 {strides = array<i32>} : memref<2x128xf32, #tpu.memory_space<vmem>>, vector<2x128xf32>,
    return
  }
}

</mosaic_0001>

<bundles_post_ra>
// kernel: tpu_custom_call.1
= control target key start
LH: loop header
LB: loop body
LE: loop exit
PB: predicated region body
PF: predicated region fallthrough
CT: control target
= control target key end

     0   :  { %15 = vsyncpa [#allocation3], 0  ;;  %s1656_s0 = inlined_call_operand.vmem [shape: f32[2,8,32], index: 0, kind: input, shape index: {}]   ;;  %s1657_s1 = inlined_call_operand.hbm [shape: f32[2,1,8], index: 1, kind: input, shape index: {}]   ;;  %s1658_s2 = inlined_call_operand.hbm [shape: f32[2,32], index: 2, kind: input, shape index: {}]   ;;  %s1659_s3 = inlined_call_operand.vmem [shape: bf16[32,96], index: 3, kind: input, shape index: {}]   ;;  %s1660_s4 = inlined_call_operand.vmem [shape: bf16[32,32], index: 4, kind: input, shape index: {}]   ;;  %s1661_s5 = inlined_call_operand.vmem [shape: bf16[32,128], index: 5, kind: input, shape index: {}]   ;;  %s1662_s6 = inlined_call_operand.vmem [shape: bf16[128,32], index: 6, kind: input, shape index: {}]   ;;  %s1663_s7 = inlined_call_operand.vmem [shape: bf16[32,32], index: 7, kind: input, shape index: {}]   ;;  %s1664_s8 = inlined_call_operand.hbm [shape: bf16[32,128], index: 8, kind: input, shape index: {}]   ;;  %s1665_s9 = inlined_call_operand.hbm [shape: f32[10,128], index: 9, kind: input, shape index: {}]   ;;  %s1666_s10 = inlined_call_operand.hbm [shape: f32[2,128], index: 10, kind: output, shape index: {}]  }
   0x1   :  { %16 = vsyncpa [#allocation6], 0 }
   0x2   :  { %17 = vsyncpa [#allocation9], 0  ;;  %s39_s15 = sshll.u32 %s1658_s2, 4  ;;  %s40_s15 = int_to_ptr.hbm [resolvable:$true] %s39_s15 }
   0x3   :  { %18 = vsyncpa [#allocation4], 0  ;;  %s1378_s16 = smov [#allocation5]   ;;  %s25_s20 = sshll.u32 %s1657_s1, 4  ;;  %s26_s20 = int_to_ptr.hbm [resolvable:$true] %s25_s20 }
   0x4   :  { %s41_s17 = sshll.u32 %s1378_s16, 4  ;;  %s1379_s21 = smov [#allocation2]   ;;  %s42_s17 = int_to_ptr.vmem [resolvable:$true] %s41_s17 }
   0x5   :  { %44 = dma.hbm_to_vmem [thread:$0]  %s40_s15, 32, %s42_s17, [#allocation6]  }
   0x6   :  { %s27_s22 = sshll.u32 %s1379_s21, 4  ;;  %s1380_s23 = smov 16   ;;  %s28_s22 = int_to_ptr.vmem [resolvable:$true] %s27_s22 }
   0x7   :  { %s1381_s24 = smov 1   ;;  %s59_s26 = sshll.u32 %s1664_s8, 4  ;;  %s60_s26 = int_to_ptr.hbm [resolvable:$true] %s59_s26 }
   0x8   :  { %33 = dma.hbm_to_vmem [thread:$0]  %s26_s20, 32, %s28_s22, [#allocation3], %s1380_s23, %s1380_s23, %s1381_s24  }
   0x9   :  { %s1382_s27 = smov [#allocation7]   ;;  %s72_s30 = sshll.u32 %s1665_s9, 4  ;;  %s73_s30 = int_to_ptr.hbm [resolvable:$true] %s72_s30 }
   0xa   :  { %s61_s28 = sshll.u32 %s1382_s27, 4  ;;  %s1383_s11 = smov 64   ;;  %s62_s28 = int_to_ptr.vmem [resolvable:$true] %s61_s28 }
   0xb   :  { %s1384_s12 = smov 4   ;;  %s1385_s13 = smov [#allocation8]  }
   0xc   :  { %67 = dma.hbm_to_vmem [thread:$0]  %s60_s26, 256, %s62_s28, [#allocation6], %s1383_s11, %s1383_s11, %s1384_s12  }
   0xd   :  { %s74_s14 = sshll.u32 %s1385_s13, 4  ;;  %s1386_s15 = smov 128   ;;  %s75_s14 = int_to_ptr.vmem [resolvable:$true] %s74_s14 }
   0xe   :  { %s1387_s16 = smov 8  }
   0xf   :  { %80 = dma.hbm_to_vmem [thread:$0]  %s73_s30, 256, %s75_s14, [#allocation9], %s1386_s15, %s1386_s15, %s1387_s16  }
  0x10   :  { %1370 = dma.done.wait [#allocation3], 32  }
  0x11   :  { %1371 = vsyncadd [#allocation3], 4294967264 }
  0x12   :  { %1372 = dma.done.wait [#allocation6], 288  }
  0x13   :  { %1373 = vsyncadd [#allocation6], 4294967008 }
  0x14   :  { %1374 = dma.done.wait [#allocation9], 256  }
  0x15   :  { %1375 = vsyncadd [#allocation9], 4294967040  ;;  %v1141_v0 = vld [vmem:[%s1659_s3 + $0x8] sm:$0xff]  ;;  %v1140_v1 = vld [vmem:[%s1659_s3] sm:$0xff]  ;;  %vm128_vm0 = vcmask 261120   ;;  %s1388_s3 = smov 112  }
  0x16   :  { %v1476_v2 = vld [vmem:[%s1656_s0] sm:$0xff]  ;;  %v1481_v3 = vld [vmem:[%s1656_s0 + $0x8] sm:$0xff]  ;;  %138 = vmatpush.bf16.msra.mxu0 %v1141_v0  ;;  %v1190_v5 = vld [vmem:[#allocation8] ss:$0 sm:$0xff]  ;;  %s1389_s24 = smov 120   ;;  %s1390_s0 = smov 104  }
  0x17   :  { %v110_v4 = vpack.c.bf16 %v1481_v3, %v1476_v2  ;;  %s1391_s2 = smov 96   ;;  %vm187_vm1 = vcmask 64512   ;;  %v1518_v48 = vld [vmem:[#allocation2] ss:$0 sm:$0xff]  ;;  %vm476_vm2 = vcmask 1043456   ;;  %s1392_s25 = smov 24  }
  0x18   :  { %vm666_vm3 = vcmask 130048   ;;  %vm669_vm4 = vcmask 195584   ;;  %s1035_s28 = sshll.u32 %s1666_s10, 4  ;;  %s1036_s28 = int_to_ptr.hbm [resolvable:$true] %s1035_s28 }
  0x1a   :  { %139 = vmatpush.bf16.msra.mxu0 %v1140_v1 }
  0x1d   :  { %1055 = vmatmul.msk.bf16.vlgmr.msra.gmra.mxu0 %vm128_vm0, %v110_v4 }
  0x9a   :  { %v141_v6 = vpop.f32.mrf.mxu0 }
  0x9b   :  { %v142_v7 = vadd.f32 %v1190_v5, %v141_v6 }
  0x9d   :  { %154 = vrot.lane.b32.xlu2 %v142_v7, %s1388_s3  ;;  %148 = vrot.lane.b32.xlu0 %v142_v7, %s1389_s24  ;;  %v166_v10 = vpack.c.bf16 %v142_v7, %v142_v7 }
  0x9f   :  { %v183_v12 = vunpack.c.l.b16 %v166_v10 }
  0xa1   :  { %v184_v14 = vpack.c.b16 %v183_v12, %v183_v12 }
  0xa2   :  { %v143_v8 = vpop.f32.mrf.mxu0 }
  0xa3   :  { %v144_v9 = vadd.f32 %v1190_v5, %v143_v8  ;;  %v1192_v5 = vld [vmem:[#allocation2 + $0x1] ss:$0 sm:$0xff] }
  0xa5   :  { %156 = vrot.lane.b32.xlu1 %v144_v9, %s1388_s3  ;;  %162 = vrot.lane.b32.xlu2 %v144_v9, %s1390_s0  ;;  %v167_v11 = vpack.c.bf16 %v144_v9, %v144_v9 }
  0xa6   :  { %150 = vrot.lane.b32.xlu0 %v144_v9, %s1389_s24 }
  0xa7   :  { %v208_v13 = vunpack.c.l.b16 %v167_v11 }
  0xa9   :  { %v209_v15 = vpack.c.b16 %v208_v13, %v208_v13 }
  0xad   :  { %160 = vrot.lane.b32.xlu1 %v142_v7, %s1390_s0  ;;  %185 = vrot.lane.b32.xlu2 %v184_v14, %s1391_s2 }
  0xae   :  { %210 = vrot.lane.b32.xlu0 %v209_v15, %s1391_s2 }
  0xf7   :  { %v155_v16 = vpop.permute.xlu2 %154 }
  0xf8   :  { %v170_v32 = vpack.c.bf16 %v155_v16, %v155_v16 }
  0xfa   :  { %v280_v38 = vunpack.c.l.b16 %v170_v32 }
  0xfc   :  { %v1504_v43 = vpack.c.b16 %v280_v38, %v280_v38 }
  0xff   :  { %v163_v17 = vpop.permute.xlu2 %162 }
 0x100   :  { %v1491_v30 = vpack.c.bf16 %v163_v17, %v163_v17 }
 0x102   :  { %v352_v35 = vunpack.c.l.b16 %v1491_v30 }
 0x104   :  { %v1500_v41 = vpack.c.b16 %v352_v35, %v352_v35 }
 0x107   :  { %v186_v18 = vpop.permute.xlu2 %185 }
 0x108   :  { %v192_v19 = vsel %vm187_vm1, %v186_v18, 0 }
 0x109   :  { %201 = vmatpush.bf16.xpose.msra.mxu1 %v192_v19 }
 0x10f   :  { %v149_v20 = vpop.permute.xlu0 %148 }
 0x110   :  { %v168_v21 = vpack.c.bf16 %v149_v20, %v149_v20  ;;  %1056 = vmatmul.msk.bf16.vlgmr.msra.gmra.mxu1 %vm187_vm1, %v166_v10 }
 0x112   :  { %v232_v22 = vunpack.c.l.b16 %v168_v21 }
 0x114   :  { %v233_v23 = vpack.c.b16 %v232_v22, %v232_v22 }
 0x116   :  { %234 = vrot.lane.b32.xlu1 %v233_v23, %s1391_s2 }
 0x117   :  { %v157_v24 = vpop.permute.xlu1 %156 }
 0x118   :  { %v171_v25 = vpack.c.bf16 %v157_v24, %v157_v24  ;;  %v151_v26 = vpop.permute.xlu0 %150 }
 0x119   :  { %v169_v27 = vpack.c.bf16 %v151_v26, %v151_v26 }
 0x11a   :  { %v304_v28 = vunpack.c.l.b16 %v171_v25 }
 0x11b   :  { %v256_v29 = vunpack.c.l.b16 %v169_v27 }
 0x11c   :  { %v1493_v31 = vpack.c.b16 %v304_v28, %v304_v28 }
 0x11d   :  { %v257_v33 = vpack.c.b16 %v256_v29, %v256_v29 }
 0x11e   :  { %306 = vrot.lane.b32.xlu1 %v1493_v31, %s1391_s2 }
 0x11f   :  { %258 = vrot.lane.b32.xlu0 %v257_v33, %s1391_s2  ;;  %v161_v34 = vpop.permute.xlu1 %160 }
 0x120   :  { %v172_v36 = vpack.c.bf16 %v161_v34, %v161_v34  ;;  %v211_v37 = vpop.permute.xlu0 %210 }
 0x121   :  { %v216_v39 = vsel %vm187_vm1, %v211_v37, 0 }
 0x122   :  { %v328_v40 = vunpack.c.l.b16 %v172_v36  ;;  %225 = vmatpush.bf16.xpose.msra.mxu2 %v216_v39 }
 0x124   :  { %v1502_v42 = vpack.c.b16 %v328_v40, %v328_v40 }
 0x126   :  { %354 = vrot.lane.b32.xlu1 %v1500_v41, %s1391_s2  ;;  %330 = vrot.lane.b32.xlu2 %v1502_v42, %s1391_s2 }
 0x127   :  { %282 = vrot.lane.b32.xlu0 %v1504_v43, %s1391_s2 }
 0x129   :  { %1057 = vmatmul.msk.bf16.vlgmr.msra.gmra.mxu2 %vm187_vm1, %v167_v11 }
 0x12e   :  { %493 = vrot.lane.b32.xlu1 %v209_v15, %s1383_s11  ;;  %514 = vrot.lane.b32.xlu2 %v233_v23, %s1383_s11 }
 0x12f   :  { %471 = vrot.lane.b32.xlu0 %v184_v14, %s1383_s11 }
 0x180   :  { %v331_v44 = vpop.permute.xlu2 %330 }
 0x181   :  { %v336_v47 = vsel %vm187_vm1, %v331_v44, 0 }
 0x188   :  { %v235_v45 = vpop.permute.xlu1 %234  ;;  %v515_v50 = vpop.permute.xlu2 %514 }
 0x189   :  { %v240_v46 = vsel %vm187_vm1, %v235_v45, 0  ;;  %v520_v54 = vsel %vm476_vm2, %v515_v50, 0 }
 0x18a   :  { %249 = vmatpush.bf16.xpose.msra.mxu3 %v240_v46 }
 0x18d   :  { %v203_v49 = vpop.f32.mrf.mxu1 }
 0x18e   :  { %v204_v51 = vadd.f32 %v1518_v48, %v203_v49 }
 0x190   :  { %v307_v52 = vpop.permute.xlu1 %306  ;;  %v375_v53 = vsel %vm187_vm1, %v204_v51, -inf }
 0x191   :  { %v259_v55 = vpop.permute.xlu0 %258  ;;  %1058 = vmatmul.msk.bf16.vlgmr.msra.gmra.mxu3 %vm187_vm1, %v168_v21  ;;  %376 = vmax.xlane.f32.xlu1 %v375_v53  ;;  %v312_v56 = vsel %vm187_vm1, %v307_v52, 0 }
 0x192   :  { %345 = vmatpush.bf16.xpose.msrb.mxu3 %v336_v47  ;;  %v264_v57 = vsel %vm187_vm1, %v259_v55, 0  ;;  %321 = vmatpush.bf16.xpose.msrb.mxu2 %v312_v56 }
 0x193   :  { %273 = vmatpush.bf16.xpose.msrb.mxu0 %v264_v57 }
 0x195   :  { %v205_v58 = vpop.f32.mrf.mxu1 }
 0x198   :  { %v355_v59 = vpop.permute.xlu1 %354 }
 0x199   :  { %v360_v60 = vsel %vm187_vm1, %v355_v59, 0  ;;  %v283_v61 = vpop.permute.xlu0 %282  ;;  %1061 = vmatmul.msk.bf16.vlgmr.msrb.gmra.mxu2 %vm187_vm1, %v171_v25 }
 0x19a   :  { %529 = vmatpush.bf16.msra.mxu3 %v520_v54  ;;  %1059 = vmatmul.msk.bf16.vlgmr.msrb.gmra.mxu0 %vm187_vm1, %v169_v27  ;;  %v288_v62 = vsel %vm187_vm1, %v283_v61, 0 }
 0x19b   :  { %297 = vmatpush.bf16.xpose.msrb.mxu1 %v288_v62  ;;  %369 = vmatpush.bf16.xpose.msra.mxu0 %v360_v60 }
 0x1a0   :  { %v494_v63 = vpop.permute.xlu1 %493 }
 0x1a1   :  { %v499_v0 = vsel %vm476_vm2, %v494_v63, 0  ;;  %v472_v1 = vpop.permute.xlu0 %471  ;;  %1062 = vmatmul.msk.bf16.vlgmr.msrb.gmra.mxu3 %vm187_vm1, %v172_v36 }
 0x1a2   :  { %v478_v4 = vsel %vm476_vm2, %v472_v1, 0  ;;  %1060 = vmatmul.msk.bf16.vlgmr.msrb.gmra.mxu1 %vm187_vm1, %v170_v32  ;;  %508 = vmatpush.bf16.msra.mxu2 %v499_v0 }
 0x1a3   :  { %487 = vmatpush.bf16.msra.mxu1 %v478_v4 }
 0x1aa   :  { %1063 = vmatmul.msk.bf16.vlgmr.msra.gmra.mxu0 %vm187_vm1, %v1491_v30  ;;  %535 = vrot.lane.b32.xlu1 %v257_v33, %s1383_s11 }
 0x1ac   :  { %v227_v6 = vpop.f32.mrf.mxu2 }
 0x1ad   :  { %v228_v7 = vadd.f32 %v1192_v5, %v227_v6 }
 0x1af   :  { %v378_v8 = vsel %vm187_vm1, %v228_v7, -inf }
 0x1b0   :  { %379 = vmax.xlane.f32.xlu2 %v378_v8 }
 0x1b4   :  { %v229_v9 = vpop.f32.mrf.mxu2 }
 0x204   :  { %v377_v10 = vpop.xlane.xlu1 %376 }
 0x205   :  { %v399_v11 = vsub.f32 %v204_v51, %v377_v10 }
 0x207   :  { %v407_v13 = vmul.f32 1.442695, %v399_v11 }
 0x209   :  { %1202 = vpow2.f32 %v407_v13 }
 0x20f   :  { %v1203_v23 = vpop.eup %1202 }
 0x210   :  { %v423_v28 = vsel %vm187_vm1, %v1203_v23, 0.0 }
 0x214   :  { %v251_v12 = vpop.f32.mrf.mxu3 }
 0x215   :  { %v252_v14 = vadd.f32 %v1518_v48, %v251_v12 }
 0x217   :  { %v275_v15 = vpop.f32.mrf.mxu0  ;;  %v381_v16 = vsel %vm187_vm1, %v252_v14, -inf }
 0x218   :  { %v276_v17 = vadd.f32 %v1192_v5, %v275_v15  ;;  %382 = vmax.xlane.f32.xlu0 %v381_v16 }
 0x21a   :  { %v384_v18 = vsel %vm187_vm1, %v276_v17, -inf }
 0x21b   :  { %385 = vmax.xlane.f32.xlu2 %v384_v18 }
 0x21c   :  { %v253_v19 = vpop.f32.mrf.mxu3  ;;  %v323_v20 = vpop.f32.mrf.mxu2 }
 0x21d   :  { %v536_v21 = vpop.permute.xlu1 %535  ;;  %v324_v35 = vadd.f32 %v1192_v5, %v323_v20 }
 0x21e   :  { %v541_v22 = vsel %vm476_vm2, %v536_v21, 0 }
 0x21f   :  { %v277_v24 = vpop.f32.mrf.mxu0  ;;  %v299_v25 = vpop.f32.mrf.mxu1  ;;  %550 = vmatpush.bf16.msrb.mxu0 %v541_v22  ;;  %v390_v40 = vsel %vm187_vm1, %v324_v35, -inf }
 0x220   :  { %v300_v26 = vadd.f32 %v1518_v48, %v299_v25 }
 0x222   :  { %v387_v27 = vsel %vm187_vm1, %v300_v26, -inf }
 0x223   :  { %388 = vmax.xlane.f32.xlu1 %v387_v27  ;;  %424 = vadd.xlane.f32.xlu2 %v423_v28  ;;  %v380_v29 = vpop.xlane.xlu2 %379 }
 0x224   :  { %v400_v30 = vsub.f32 %v228_v7, %v380_v29  ;;  %v325_v32 = vpop.f32.mrf.mxu2  ;;  %v347_v33 = vpop.f32.mrf.mxu3 }
 0x225   :  { %v348_v34 = vadd.f32 %v1518_v48, %v347_v33 }
 0x226   :  { %v409_v36 = vmul.f32 1.442695, %v400_v30 }
 0x227   :  { %v301_v37 = vpop.f32.mrf.mxu1  ;;  %v371_v38 = vpop.f32.mrf.mxu0  ;;  %v393_v39 = vsel %vm187_vm1, %v348_v34, -inf }
 0x228   :  { %1204 = vpow2.f32 %v409_v36  ;;  %394 = vmax.xlane.f32.xlu0 %v393_v39  ;;  %v372_v46 = vadd.f32 %v1192_v5, %v371_v38 }
 0x22a   :  { %v396_v48 = vsel %vm187_vm1, %v372_v46, -inf }
 0x22b   :  { %391 = vmax.xlane.f32.xlu2 %v390_v40 }
 0x22c   :  { %v349_v44 = vpop.f32.mrf.mxu3 }
 0x22e   :  { %v1205_v45 = vpop.eup %1204 }
 0x22f   :  { %v373_v47 = vpop.f32.mrf.mxu0  ;;  %v426_v49 = vsel %vm187_vm1, %v1205_v45, 0.0 }
 0x230   :  { %427 = vadd.xlane.f32.xlu0 %v426_v49 }
 0x233   :  { %397 = vmax.xlane.f32.xlu2 %v396_v48 }
 0x24b   :  { %577 = vrot.lane.b32.xlu2 %v1493_v31, %s1383_s11 }
 0x28b   :  { %v383_v53 = vpop.xlane.xlu0 %382 }
 0x28c   :  { %v401_v58 = vsub.f32 %v252_v14, %v383_v53 }
 0x28e   :  { %v386_v50 = vpop.xlane.xlu2 %385  ;;  %v411_v31 = vmul.f32 1.442695, %v401_v58 }
 0x28f   :  { %v402_v51 = vsub.f32 %v276_v17, %v386_v50 }
 0x291   :  { %v413_v52 = vmul.f32 1.442695, %v402_v51 }
 0x293   :  { %1206 = vpow2.f32 %v413_v52 }
 0x296   :  { %v389_v54 = vpop.xlane.xlu1 %388  ;;  %v425_v55 = vpop.xlane.xlu2 %424 }
 0x297   :  { %v403_v56 = vsub.f32 %v300_v26, %v389_v54  ;;  %1208 = vrcp.f32 %v425_v55 }
 0x299   :  { %v1207_v57 = vpop.eup %1206  ;;  %v415_v59 = vmul.f32 1.442695, %v403_v56 }
 0x29a   :  { %v432_v60 = vsel %vm187_vm1, %v1207_v57, 0.0 }
 0x29b   :  { %1210 = vpow2.f32 %v415_v59  ;;  %433 = vadd.xlane.f32.xlu0 %v432_v60  ;;  %v395_v61 = vpop.xlane.xlu0 %394 }
 0x29c   :  { %v405_v62 = vsub.f32 %v348_v34, %v395_v61 }
 0x29d   :  { %v1209_v63 = vpop.eup %1208 }
 0x29e   :  { %v455_v0 = vmul.f32 %v1209_v63, %v1203_v23  ;;  %v419_v1 = vmul.f32 1.442695, %v405_v62  ;;  %v392_v4 = vpop.xlane.xlu2 %391 }
 0x29f   :  { %v404_v5 = vsub.f32 %v324_v35, %v392_v4 }
 0x2a0   :  { %v463_v6 = vpack.c.bf16 %v455_v0, %v455_v0  ;;  %1212 = vpow2.f32 %v419_v1 }
 0x2a1   :  { %v1553_v7 = vpop.eup %1210  ;;  %1214 = vpow2.f32 %v411_v31  ;;  %v417_v8 = vmul.f32 1.442695, %v404_v5 }
 0x2a2   :  { %1064 = vmatmul.msk.bf16.vlgmr.msra.gmra.mxu1 %vm187_vm1, %v463_v6  ;;  %v435_v9 = vsel %vm187_vm1, %v1553_v7, 0.0 }
 0x2a3   :  { %1216 = vpow2.f32 %v417_v8  ;;  %436 = vadd.xlane.f32.xlu1 %v435_v9  ;;  %v428_v10 = vpop.xlane.xlu0 %427 }
 0x2a4   :  { %1218 = vrcp.f32 %v428_v10 }
 0x2a6   :  { %v1213_v11 = vpop.eup %1212  ;;  %v398_v12 = vpop.xlane.xlu2 %397 }
 0x2a7   :  { %v1215_v13 = vpop.eup %1214  ;;  %v406_v14 = vsub.f32 %v372_v46, %v398_v12  ;;  %v441_v15 = vsel %vm187_vm1, %v1213_v11, 0.0 }
 0x2a8   :  { %442 = vadd.xlane.f32.xlu2 %v441_v15  ;;  %v429_v19 = vsel %vm187_vm1, %v1215_v13, 0.0  ;;  %v1142_v15 = vld [vmem:[%s1660_s4] sm:$0xff] }
 0x2a9   :  { %v1217_v16 = vpop.eup %1216  ;;  %v421_v17 = vmul.f32 1.442695, %v406_v14  ;;  %v1143_v14 = vld [vmem:[%s1660_s4 + $0x8] sm:$0xff] }
 0x2aa   :  { %v1219_v18 = vpop.eup %1218  ;;  %v438_v20 = vsel %vm187_vm1, %v1217_v16, 0.0 }
 0x2ab   :  { %v456_v21 = vmul.f32 %v1219_v18, %v1205_v45  ;;  %1220 = vpow2.f32 %v421_v17  ;;  %430 = vadd.xlane.f32.xlu1 %v429_v19  ;;  %439 = vadd.xlane.f32.xlu0 %v438_v20 }
 0x2ad   :  { %v464_v22 = vpack.c.bf16 %v456_v21, %v456_v21 }
 0x2ae   :  { %v578_v23 = vpop.permute.xlu2 %577 }
 0x2af   :  { %v583_v24 = vsel %vm476_vm2, %v578_v23, 0  ;;  %1065 = vmatmul.msk.bf16.vlgmr.msra.gmra.mxu2 %vm187_vm1, %v464_v22 }
 0x2b0   :  { %592 = vmatpush.bf16.msrb.mxu2 %v583_v24 }
 0x2b1   :  { %v1221_v25 = vpop.eup %1220 }
 0x2b2   :  { %v444_v26 = vsel %vm187_vm1, %v1221_v25, 0.0 }
 0x2b3   :  { %445 = vadd.xlane.f32.xlu0 %v444_v26 }
 0x2c0   :  { %619 = vrot.lane.b32.xlu2 %v1500_v41, %s1383_s11 }
 0x2c4   :  { %598 = vrot.lane.b32.xlu1 %v1502_v42, %s1383_s11 }
 0x2c7   :  { %556 = vrot.lane.b32.xlu0 %v1504_v43, %s1383_s11 }
 0x30e   :  { %v434_v27 = vpop.xlane.xlu0 %433 }
 0x30f   :  { %1222 = vrcp.f32 %v434_v27 }
 0x315   :  { %v1223_v28 = vpop.eup %1222 }
 0x316   :  { %v458_v29 = vmul.f32 %v1223_v28, %v1207_v57  ;;  %v437_v30 = vpop.xlane.xlu1 %436 }
 0x318   :  { %v466_v32 = vpack.c.bf16 %v458_v29, %v458_v29 }
 0x31a   :  { %1067 = vmatmul.msk.bf16.vlgmr.msrb.gmra.mxu0 %vm187_vm1, %v466_v32 }
 0x31b   :  { %v443_v33 = vpop.xlane.xlu2 %442 }
 0x31e   :  { %v431_v34 = vpop.xlane.xlu1 %430  ;;  %v440_v35 = vpop.xlane.xlu0 %439 }
 0x31f   :  { %1224 = vrcp.f32 %v431_v34  ;;  %v1571_v36 = vpop.f32.mrf.mxu1 }
 0x320   :  { %1226 = vrcp.f32 %v440_v35 }
 0x323   :  { %v620_v41 = vpop.permute.xlu2 %619 }
 0x324   :  { %v625_v42 = vsel %vm476_vm2, %v620_v41, 0 }
 0x325   :  { %v1225_v37 = vpop.eup %1224  ;;  %634 = vmatpush.bf16.msra.mxu0 %v625_v42 }
 0x326   :  { %v1227_v43 = vpop.eup %1226  ;;  %v457_v38 = vmul.f32 %v1225_v37, %v1215_v13  ;;  %v446_v39 = vpop.xlane.xlu0 %445 }
 0x327   :  { %v460_v40 = vmul.f32 %v1227_v43, %v1217_v16  ;;  %1228 = vrcp.f32 %v446_v39  ;;  %v491_v44 = vpop.f32.mrf.mxu1  ;;  %v1393_v39 = vmov 32.0  }
 0x328   :  { %v465_v45 = vpack.c.bf16 %v457_v38, %v457_v38  ;;  %1230 = vrcp.f32 %v443_v33  ;;  %v1193_v33 = vld [vmem:[#allocation8 + $0x1] ss:$0 sm:$0xff] }
 0x329   :  { %v468_v46 = vpack.c.bf16 %v460_v40, %v460_v40  ;;  %1232 = vrcp.f32 %v437_v30 }
 0x32a   :  { %1066 = vmatmul.msk.bf16.vlgmr.msra.gmra.mxu3 %vm187_vm1, %v465_v45  ;;  %1234 = vrcp.f32 %v1393_v39 }
 0x32b   :  { %1069 = vmatmul.msk.bf16.vlgmr.msrb.gmra.mxu2 %vm187_vm1, %v468_v46 }
 0x32d   :  { %v1229_v47 = vpop.eup %1228 }
 0x32e   :  { %v462_v49 = vmul.f32 %v1229_v47, %v1221_v25  ;;  %v1231_v50 = vpop.eup %1230 }
 0x32f   :  { %v1233_v52 = vpop.eup %1232  ;;  %v461_v53 = vmul.f32 %v1231_v50, %v1213_v11 }
 0x330   :  { %v470_v48 = vpack.c.bf16 %v462_v49, %v462_v49  ;;  %v459_v56 = vmul.f32 %v1233_v52, %v1553_v7  ;;  %v1235_v40 = vpop.eup %1234 }
 0x331   :  { %v469_v57 = vpack.c.bf16 %v461_v53, %v461_v53  ;;  %v716_v44 = vmul.f32 32.0, %v1235_v40  ;;  %vm720_vm5 = vweird.f32 %v1235_v40 }
 0x332   :  { %1071 = vmatmul.msk.bf16.vlgmr.msra.gmra.mxu0 %vm187_vm1, %v470_v48  ;;  %v510_v51 = vpop.f32.mrf.mxu2  ;;  %v467_v61 = vpack.c.bf16 %v459_v56, %v459_v56 }
 0x333   :  { %v717_v45 = vsub.f32 1.0, %v716_v44 }
 0x335   :  { %v718_v46 = vmul.f32 %v1235_v40, %v717_v45 }
 0x336   :  { %v599_v54 = vpop.permute.xlu1 %598 }
 0x337   :  { %v604_v55 = vsel %vm476_vm2, %v599_v54, 0  ;;  %v719_v47 = vadd.f32 %v1235_v40, %v718_v46 }
 0x338   :  { %613 = vmatpush.bf16.msrb.mxu3 %v604_v55 }
 0x339   :  { %v557_v58 = vpop.permute.xlu0 %556  ;;  %v1598_v49 = vsel %vm720_vm5, %v1235_v40, %v719_v47 }
 0x33a   :  { %v562_v59 = vsel %vm476_vm2, %v557_v58, 0  ;;  %v512_v60 = vpop.f32.mrf.mxu2 }
 0x33b   :  { %571 = vmatpush.bf16.msrb.mxu1 %v562_v59  ;;  %1070 = vmatmul.msk.bf16.vlgmr.msrb.gmra.mxu3 %vm187_vm1, %v469_v57  ;;  %v1145_v57 = vld [vmem:[%s1661_s5 + $0x8] sm:$0xff] }
 0x33c   :  { %793 = vmatpush.bf16.msra.mxu2 %v1145_v57  ;;  %v1197_v57 = vld [vmem:[#allocation8 + $0x5] ss:$0 sm:$0xff] }
 0x33e   :  { %1068 = vmatmul.msk.bf16.vlgmr.msrb.gmra.mxu1 %vm187_vm1, %v467_v61  ;;  %v1144_v61 = vld [vmem:[%s1661_s5] sm:$0xff] }
 0x33f   :  { %699 = vmatpush.bf16.msra.mxu1 %v1143_v14  ;;  %v1194_v14 = vld [vmem:[#allocation8 + $0x2] ss:$0 sm:$0xff] }
 0x340   :  { %794 = vmatpush.bf16.msra.mxu2 %v1144_v61 }
 0x343   :  { %700 = vmatpush.bf16.msra.mxu1 %v1142_v15 }
 0x397   :  { %v552_v62 = vpop.f32.mrf.mxu0 }
 0x39f   :  { %v554_v63 = vpop.f32.mrf.mxu0 }
 0x3ad   :  { %v531_v31 = vpop.f32.mrf.mxu3 }
 0x3ae   :  { %v1175_v0 = vpack.i.bf16 %v552_v62, %v531_v31  ;;  %v594_v1 = vpop.f32.mrf.mxu2 }
 0x3af   :  { %v636_v4 = vpop.f32.mrf.mxu0 }
 0x3b0   :  { %1176 = vrot.lane.b32.xlu0 %v1175_v0, %s1387_s16 }
 0x3b5   :  { %v533_v5 = vpop.f32.mrf.mxu3 }
 0x3b6   :  { %v596_v6 = vpop.f32.mrf.mxu2 }
 0x3b7   :  { %v638_v7 = vpop.f32.mrf.mxu0 }
 0x3bb   :  { %v573_v8 = vpop.f32.mrf.mxu1 }
 0x3bc   :  { %v1180_v9 = vpack.i.bf16 %v594_v1, %v573_v8 }
 0x3be   :  { %1181 = vrot.lane.b32.xlu1 %v1180_v9, %s1380_s23  ;;  %v615_v10 = vpop.f32.mrf.mxu3 }
 0x3bf   :  { %v1185_v11 = vpack.i.bf16 %v636_v4, %v615_v10 }
 0x3c1   :  { %1186 = vrot.lane.b32.xlu2 %v1185_v11, %s1392_s25 }
 0x3c3   :  { %v575_v12 = vpop.f32.mrf.mxu1 }
 0x3c6   :  { %v617_v13 = vpop.f32.mrf.mxu3 }
 0x41b   :  { %v1187_v19 = vpop.permute.xlu2 %1186 }
 0x41c   :  { %v1189_v23 = vunpack.i.h.bf16 %v1187_v19  ;;  %v1188_v24 = vunpack.i.l.bf16 %v1187_v19 }
 0x422   :  { %v1177_v16 = vpop.permute.xlu0 %1176 }
 0x423   :  { %v1179_v17 = vunpack.i.h.bf16 %v1177_v16  ;;  %v1178_v18 = vunpack.i.l.bf16 %v1177_v16 }
 0x425   :  { %v665_v25 = vsel %vm187_vm1, %v510_v51, %v1179_v17  ;;  %v664_v26 = vsel %vm187_vm1, %v1571_v36, %v1178_v18  ;;  %v1195_v18 = vld [vmem:[#allocation8 + $0x3] ss:$0 sm:$0xff] }
 0x430   :  { %v1182_v20 = vpop.permute.xlu1 %1181 }
 0x431   :  { %v1184_v21 = vunpack.i.h.bf16 %v1182_v20  ;;  %v1183_v22 = vunpack.i.l.bf16 %v1182_v20 }
 0x433   :  { %v668_v27 = vsel %vm666_vm3, %v665_v25, %v1184_v21  ;;  %v667_v28 = vsel %vm666_vm3, %v664_v26, %v1183_v22  ;;  %v1153_v25 = vld [vmem:[%s1662_s6 + $0x38] sm:$0xff]  ;;  %v1152_v26 = vld [vmem:[%s1662_s6 + $0x30] sm:$0xff]  ;;  %vm954_vm3 = vcmask 1040384  }
 0x434   :  { %v670_v29 = vsel %vm669_vm4, %v667_v28, %v1188_v24  ;;  %v671_v30 = vsel %vm669_vm4, %v668_v27, %v1189_v23  ;;  %885 = vmatpush.bf16.msra.mxu3 %v1153_v25  ;;  %v1151_v27 = vld [vmem:[%s1662_s6 + $0x28] sm:$0xff]  ;;  %v1150_v28 = vld [vmem:[%s1662_s6 + $0x20] sm:$0xff] }
 0x435   :  { %v672_v32 = vpack.c.bf16 %v671_v30, %v670_v29  ;;  %v1149_v29 = vld [vmem:[%s1662_s6 + $0x18] sm:$0xff]  ;;  %v1148_v30 = vld [vmem:[%s1662_s6 + $0x10] sm:$0xff] }
 0x437   :  { %1080 = vmatmul.msk.bf16.vlgmr.msra.gmra.mxu1 %vm128_vm0, %v672_v32  ;;  %v1147_v32 = vld [vmem:[%s1662_s6 + $0x8] sm:$0xff] }
 0x438   :  { %886 = vmatpush.bf16.msra.mxu3 %v1152_v26 }
 0x43c   :  { %887 = vmatpush.bf16.msra.mxu3 %v1151_v27 }
 0x440   :  { %888 = vmatpush.bf16.msra.mxu3 %v1150_v28 }
 0x444   :  { %889 = vmatpush.bf16.msra.mxu3 %v1149_v29 }
 0x448   :  { %890 = vmatpush.bf16.msra.mxu3 %v1148_v30 }
 0x44c   :  { %891 = vmatpush.bf16.msra.mxu3 %v1147_v32 }
 0x4b4   :  { %v702_v34 = vpop.f32.mrf.mxu1 }
 0x4b5   :  { %v703_v35 = vadd.f32 %v1193_v33, %v702_v34 }
 0x4b7   :  { %v707_v41 = vadd.f32 %v703_v35, %v1476_v2  ;;  %v1146_v35 = vld [vmem:[%s1662_s6] sm:$0xff] }
 0x4b8   :  { %892 = vmatpush.bf16.msra.mxu3 %v1146_v35 }
 0x4b9   :  { %v709_v42 = vsel %vm128_vm0, %v707_v41, 0.0 }
 0x4ba   :  { %710 = vadd.xlane.f32.xlu0 %v709_v42 }
 0x4bc   :  { %v704_v37 = vpop.f32.mrf.mxu1 }
 0x4bd   :  { %v705_v43 = vadd.f32 %v1193_v33, %v704_v37  ;;  %v1196_v33 = vld [vmem:[#allocation8 + $0x4] ss:$0 sm:$0xff] }
 0x4bf   :  { %v708_v38 = vadd.f32 %v705_v43, %v1481_v3 }
 0x4c1   :  { %v712_v36 = vsel %vm128_vm0, %v708_v38, 0.0 }
 0x4c2   :  { %713 = vadd.xlane.f32.xlu1 %v712_v36 }
 0x52d   :  { %v711_v2 = vpop.xlane.xlu0 %710 }
 0x52e   :  { %v722_v48 = vmul.f32 %v1598_v49, %v711_v2 }
 0x530   :  { %v724_v50 = vsub.f32 %v707_v41, %v722_v48 }
 0x532   :  { %v726_v51 = vmul.f32 %v724_v50, %v724_v50 }
 0x534   :  { %v728_v3 = vsel %vm128_vm0, %v726_v51, 0.0 }
 0x535   :  { %v714_v52 = vpop.xlane.xlu1 %713  ;;  %729 = vadd.xlane.f32.xlu2 %v728_v3 }
 0x536   :  { %v723_v53 = vmul.f32 %v1598_v49, %v714_v52 }
 0x538   :  { %v725_v54 = vsub.f32 %v708_v38, %v723_v53 }
 0x53a   :  { %v727_v55 = vmul.f32 %v725_v54, %v725_v54 }
 0x53c   :  { %v731_v56 = vsel %vm128_vm0, %v727_v55, 0.0 }
 0x53d   :  { %732 = vadd.xlane.f32.xlu0 %v731_v56 }
 0x5a8   :  { %v730_v58 = vpop.xlane.xlu2 %729 }
 0x5a9   :  { %v734_v59 = vmul.f32 %v730_v58, %v1598_v49 }
 0x5ab   :  { %v736_v60 = vadd.f32 1e-12, %v734_v59 }
 0x5ad   :  { %1236 = vrsqrt.f32 %v736_v60  ;;  %vm744_vm7 = vweird.f32 %v736_v60 }
 0x5b0   :  { %v733_v62 = vpop.xlane.xlu0 %732 }
 0x5b1   :  { %v735_v63 = vmul.f32 %v733_v62, %v1598_v49 }
 0x5b3   :  { %v1237_v31 = vpop.eup %1236  ;;  %v737_v0 = vadd.f32 1e-12, %v735_v63 }
 0x5b4   :  { %v739_v1 = vmul.f32 %v1237_v31, %v736_v60  ;;  %vm745_vm6 = vweird.f32 %v1237_v31 }
 0x5b5   :  { %1238 = vrsqrt.f32 %v737_v0  ;;  %vm746_vm8 = vmor %vm744_vm7, %vm745_vm6  ;;  %vm754_vm10 = vweird.f32 %v737_v0 }
 0x5b6   :  { %v740_v4 = vmul.f32 %v1237_v31, %v739_v1 }
 0x5b8   :  { %v741_v5 = vmul.f32 0.5, %v740_v4 }
 0x5ba   :  { %v742_v6 = vsub.f32 1.5, %v741_v5 }
 0x5bb   :  { %v1239_v7 = vpop.eup %1238 }
 0x5bc   :  { %v743_v8 = vmul.f32 %v1237_v31, %v742_v6  ;;  %v749_v9 = vmul.f32 %v1239_v7, %v737_v0  ;;  %vm755_vm9 = vweird.f32 %v1239_v7 }
 0x5bd   :  { %vm756_vm11 = vmor %vm754_vm10, %vm755_vm9 }
 0x5be   :  { %v750_v10 = vmul.f32 %v1239_v7, %v749_v9  ;;  %v747_v11 = vsel %vm746_vm8, %v1237_v31, %v743_v8 }
 0x5bf   :  { %v758_v15 = vmul.f32 %v747_v11, %v724_v50 }
 0x5c0   :  { %v751_v12 = vmul.f32 0.5, %v750_v10 }
 0x5c1   :  { %v761_v19 = vmul.f32 %v1194_v14, %v758_v15  ;;  %v1155_v15 = vld [vmem:[%s1663_s7 + $0x8] sm:$0xff] }
 0x5c2   :  { %v752_v13 = vsub.f32 1.5, %v751_v12  ;;  %983 = vmatpush.bf16.msrb.mxu0 %v1155_v15 }
 0x5c3   :  { %v764_v22 = vadd.f32 %v1195_v18, %v761_v19 }
 0x5c4   :  { %v753_v16 = vmul.f32 %v1239_v7, %v752_v13 }
 0x5c6   :  { %v757_v17 = vsel %vm756_vm11, %v1239_v7, %v753_v16 }
 0x5c7   :  { %v759_v20 = vmul.f32 %v757_v17, %v725_v54  ;;  %v1154_v17 = vld [vmem:[%s1663_s7] sm:$0xff]  ;;  %s1394_s7 = smov [#allocation10]  }
 0x5c8   :  { %984 = vmatpush.bf16.msrb.mxu0 %v1154_v17  ;;  %s1033_s25 = sshll.u32 %s1394_s7, 4  ;;  %s1034_s25 = int_to_ptr.vmem [resolvable:$true] %s1033_s25 }
 0x5c9   :  { %v762_v21 = vmul.f32 %v1194_v14, %v759_v20 }
 0x5cb   :  { %v765_v23 = vadd.f32 %v1195_v18, %v762_v21 }
 0x5cd   :  { %v766_v24 = vpack.c.bf16 %v765_v23, %v764_v22 }
 0x5cf   :  { %1089 = vmatmul.msk.bf16.vlgmr.msra.gmra.mxu2 %vm128_vm0, %v766_v24 }
 0x652   :  { %v796_v34 = vpop.f32.mrf.mxu2 }
 0x653   :  { %v797_v41 = vadd.f32 %v1196_v33, %v796_v34 }
 0x655   :  { %v801_v42 = vmul.f32 %v797_v41, %v797_v41 }
 0x657   :  { %v803_v37 = vmul.f32 %v801_v42, %v797_v41 }
 0x659   :  { %v805_v43 = vmul.f32 0.044715, %v803_v37  ;;  %v1199_v37 = vld [vmem:[#allocation8 + $0x7] ss:$0 sm:$0xff] }
 0x65a   :  { %v798_v38 = vpop.f32.mrf.mxu2 }
 0x65b   :  { %v807_v36 = vadd.f32 %v805_v43, %v797_v41  ;;  %v799_v39 = vadd.f32 %v1196_v33, %v798_v38 }
 0x65d   :  { %v809_v40 = vmul.f32 0.7978846, %v807_v36  ;;  %v802_v44 = vmul.f32 %v799_v39, %v799_v39 }
 0x65f   :  { %v804_v45 = vmul.f32 %v802_v44, %v799_v39  ;;  %1240 = vtanh.f32 %v809_v40 }
 0x661   :  { %v806_v46 = vmul.f32 0.044715, %v804_v45 }
 0x663   :  { %v808_v47 = vadd.f32 %v806_v46, %v799_v39  ;;  %v1157_v46 = vld [vmem:[#allocation7 + $0x8] sm:$0xff] }
 0x664   :  { %1020 = vmatpush.bf16.msrb.mxu1 %v1157_v46 }
 0x665   :  { %v810_v2 = vmul.f32 0.7978846, %v808_v47  ;;  %v1241_v48 = vpop.eup %1240  ;;  %v1156_v47 = vld [vmem:[#allocation7] sm:$0xff] }
 0x666   :  { %v813_v50 = vadd.f32 1.0, %v1241_v48 }
 0x667   :  { %1242 = vtanh.f32 %v810_v2  ;;  %v1200_v2 = vld [vmem:[#allocation8 + $0x8] ss:$0 sm:$0xff] }
 0x668   :  { %v815_v3 = vmul.f32 0.5, %v813_v50  ;;  %1021 = vmatpush.bf16.msrb.mxu1 %v1156_v47 }
 0x66a   :  { %v817_v54 = vmul.f32 %v815_v3, %v797_v41 }
 0x66d   :  { %v1243_v51 = vpop.eup %1242 }
 0x66e   :  { %v814_v52 = vadd.f32 1.0, %v1243_v51  ;;  %v991_v51 = vld [vmem:[#allocation5] sm:$0x3] }
 0x670   :  { %v816_v53 = vmul.f32 0.5, %v814_v52 }
 0x672   :  { %v818_v55 = vmul.f32 %v816_v53, %v799_v39 }
 0x674   :  { %v819_v56 = vpack.c.bf16 %v818_v55, %v817_v54  ;;  %v1201_v55 = vld [vmem:[#allocation8 + $0x9] ss:$0 sm:$0xff] }
 0x676   :  { %893 = vmatmul.bf16.vlgmr.msra.gmra.mxu3 %v819_v56 }
 0x6f9   :  { %v894_v58 = vpop.f32.mrf.mxu3 }
 0x6fa   :  { %v895_v59 = vadd.f32 %v1197_v57, %v894_v58 }
 0x6fc   :  { %v899_v60 = vadd.f32 %v895_v59, %v764_v22 }
 0x6fe   :  { %v901_v61 = vsel %vm128_vm0, %v899_v60, 0.0 }
 0x6ff   :  { %902 = vadd.xlane.f32.xlu2 %v901_v61 }
 0x701   :  { %v896_v62 = vpop.f32.mrf.mxu3 }
 0x702   :  { %v897_v63 = vadd.f32 %v1197_v57, %v896_v62 }
 0x704   :  { %v900_v31 = vadd.f32 %v897_v63, %v765_v23 }
 0x706   :  { %v904_v0 = vsel %vm128_vm0, %v900_v31, 0.0 }
 0x707   :  { %905 = vadd.xlane.f32.xlu1 %v904_v0 }
 0x772   :  { %v903_v1 = vpop.xlane.xlu2 %902 }
 0x773   :  { %v907_v4 = vmul.f32 %v903_v1, %v1598_v49 }
 0x775   :  { %v909_v5 = vsub.f32 %v899_v60, %v907_v4 }
 0x777   :  { %v911_v6 = vmul.f32 %v909_v5, %v909_v5 }
 0x779   :  { %v913_v7 = vsel %vm128_vm0, %v911_v6, 0.0 }
 0x77a   :  { %v906_v8 = vpop.xlane.xlu1 %905  ;;  %914 = vadd.xlane.f32.xlu1 %v913_v7 }
 0x77b   :  { %v908_v9 = vmul.f32 %v906_v8, %v1598_v49 }
 0x77d   :  { %v910_v10 = vsub.f32 %v900_v31, %v908_v9 }
 0x77f   :  { %v912_v11 = vmul.f32 %v910_v10, %v910_v10 }
 0x781   :  { %v916_v12 = vsel %vm128_vm0, %v912_v11, 0.0 }
 0x782   :  { %917 = vadd.xlane.f32.xlu0 %v916_v12 }
 0x7ed   :  { %v915_v13 = vpop.xlane.xlu1 %914 }
 0x7ee   :  { %v919_v14 = vmul.f32 %v915_v13, %v1598_v49 }
 0x7f0   :  { %v921_v16 = vadd.f32 1e-12, %v919_v14 }
 0x7f2   :  { %1244 = vrsqrt.f32 %v921_v16  ;;  %vm929_vm13 = vweird.f32 %v921_v16 }
 0x7f5   :  { %v918_v18 = vpop.xlane.xlu0 %917 }
 0x7f6   :  { %v920_v19 = vmul.f32 %v918_v18, %v1598_v49  ;;  %v1198_v49 = vld [vmem:[#allocation8 + $0x6] ss:$0 sm:$0xff] }
 0x7f8   :  { %v1245_v20 = vpop.eup %1244  ;;  %v922_v21 = vadd.f32 1e-12, %v920_v19 }
 0x7f9   :  { %v924_v22 = vmul.f32 %v1245_v20, %v921_v16  ;;  %vm930_vm12 = vweird.f32 %v1245_v20 }
 0x7fa   :  { %1246 = vrsqrt.f32 %v922_v21  ;;  %vm931_vm14 = vmor %vm929_vm13, %vm930_vm12  ;;  %vm939_vm1 = vweird.f32 %v922_v21 }
 0x7fb   :  { %v925_v23 = vmul.f32 %v1245_v20, %v924_v22 }
 0x7fd   :  { %v926_v24 = vmul.f32 0.5, %v925_v23 }
 0x7ff   :  { %v927_v25 = vsub.f32 1.5, %v926_v24 }
 0x800   :  { %v1247_v26 = vpop.eup %1246 }
 0x801   :  { %v934_v27 = vmul.f32 %v1247_v26, %v922_v21  ;;  %v928_v28 = vmul.f32 %v1245_v20, %v927_v25  ;;  %vm940_vm15 = vweird.f32 %v1247_v26 }
 0x802   :  { %vm941_vm2 = vmor %vm939_vm1, %vm940_vm15 }
 0x803   :  { %v935_v29 = vmul.f32 %v1247_v26, %v934_v27  ;;  %v932_v32 = vsel %vm931_vm14, %v1245_v20, %v928_v28 }
 0x804   :  { %v943_v35 = vmul.f32 %v932_v32, %v909_v5 }
 0x805   :  { %v936_v30 = vmul.f32 0.5, %v935_v29 }
 0x806   :  { %v946_v43 = vmul.f32 %v1198_v49, %v943_v35 }
 0x807   :  { %v937_v33 = vsub.f32 1.5, %v936_v30 }
 0x808   :  { %v949_v39 = vadd.f32 %v1199_v37, %v946_v43 }
 0x809   :  { %v938_v34 = vmul.f32 %v1247_v26, %v937_v33 }
 0x80b   :  { %v942_v41 = vsel %vm941_vm2, %v1247_v26, %v938_v34 }
 0x80c   :  { %v944_v42 = vmul.f32 %v942_v41, %v910_v10 }
 0x80e   :  { %v947_v38 = vmul.f32 %v1198_v49, %v944_v42 }
 0x810   :  { %v950_v36 = vadd.f32 %v1199_v37, %v947_v38 }
 0x812   :  { %v952_v40 = vrot.slane %v950_v36, 7 }
 0x814   :  { %v955_v44 = vsel %vm954_vm3, %v949_v39, %v952_v40 }
 0x815   :  { %v956_v45 = vpack.c.bf16 %v955_v44, %v955_v44 }
 0x817   :  { %1130 = vmatmul.msk.bf16.vlgmr.msrb.gmra.mxu0 %vm128_vm0, %v956_v45 }
 0x894   :  { %v986_v48 = vpop.f32.mrf.mxu0 }
 0x895   :  { %v987_v50 = vadd.f32 %v1200_v2, %v986_v48 }
 0x897   :  { %1248 = vtanh.f32 %v987_v50 }
 0x89c   :  { %v988_v3 = vpop.f32.mrf.mxu0 }
 0x89d   :  { %v1249_v52 = vpop.eup %1248 }
 0x89e   :  { %v992_v53 = vmul.f32 %v1249_v52, %v991_v51 }
 0x8a0   :  { %v993_v54 = vpack.c.bf16 %v992_v53, %v992_v53 }
 0x8a2   :  { %1139 = vmatmul.msk.bf16.vlgmr.msrb.gmra.mxu1 %vm128_vm0, %v993_v54 }
 0x91f   :  { %v1023_v56 = vpop.f32.mrf.mxu1 }
 0x920   :  { %v1024_v57 = vadd.f32 %v1201_v55, %v1023_v56 }
 0x922   :  { %1027 = vst [vmem:[#allocation10] sm:$0x3] %v1024_v57 }
 0x923   :  { %1038 = dma.vmem_to_hbm [thread:$0]  %s1034_s25, 32, %s1036_s28, [#allocation4]  }
 0x927   :  { %v1025_v58 = vpop.f32.mrf.mxu1 }
 0x928   :  { %1376 = dma.done.wait [#allocation4], 32  }
 0x929   :  { %1377 = vsyncadd [#allocation4], 4294967264 }
 0x92a   :  { %1043 = vsyncpa [#allocation3], 1 }
 0x92b   :  { %1044 = vsyncpa [#allocation6], 1 }
 0x92c   :  { %1045 = vsyncpa [#allocation9], 1 }
 0x92d   :  { %1046 = vsyncpa [#allocation4], 1 }

</bundles_post_ra>
